<compile_context>
chip_gen: v5e
topology: v5e:2x2
jax: 0.10.0
libtpu: 0.0.40
codegen_flags: <defaults>
</compile_context>

<pallas_src>
import jax
import jax.numpy as jnp
from jax.experimental import pallas as pl
from jax.experimental.pallas import tpu as pltpu

EPS = 1e-5


def _round_up(n, m=128):
    return ((n + m - 1) // m) * m


def _vmem_ceiling_bytes():
    """Generation-aware scoped-VMEM ceiling (keep ~1/8 headroom for compiler use)."""
    try:
        cap = int(pltpu.get_tpu_info().vmem_capacity_bytes)
    except Exception:
        cap = 64 * 1024 * 1024  # conservative default (v7x per-core VMEM)
    return (cap * 7) // 8


def _clamp_vmem(requested, ceiling):
    return int(max(16 * 1024 * 1024, min(requested, ceiling)))


def _bn_relu_fused(v, gamma, beta):
    """Training-mode BatchNorm1d (biased variance, centered two-pass) + ReLU.

    gamma*rsqrt(var+eps) is folded into one per-feature scale, so the elementwise
    tail is a single multiply-add + max.  Centered variance cannot go negative.
    """
    inv_n = 1.0 / v.shape[0]
    mu = jnp.sum(v, axis=0, keepdims=True) * inv_n
    d = v - mu
    var = jnp.sum(d * d, axis=0, keepdims=True) * inv_n
    scale = gamma * jax.lax.rsqrt(var + EPS)
    return jnp.maximum(d * scale + beta, 0.0)


# ---------------------------------------------------------------------------
# Kernel bodies
# ---------------------------------------------------------------------------

def _resident_kernel(x_ref, fc1w_ref, fc1b_ref, bn1g_ref, bn1b_ref,
                     bw2_ref, bn2_ref, lw_ref, lb_ref, out_ref):
    """All weights VMEM-resident; residual blocks in an unrolled in-kernel loop."""
    # fc1 -> bn1 -> relu  (f32 accumulation on the MXU)
    h = jnp.dot(x_ref[...], fc1w_ref[...],
                preferred_element_type=jnp.float32) + fc1b_ref[...]
    h = _bn_relu_fused(h, bn1g_ref[...], bn1b_ref[...])

    nblk = bw2_ref.shape[0]

    def block(i, h):
        # Residual LinearBlock i: h + relu(bn2(fc2(h)))  (fc1 branch is dead code).
        w2 = bw2_ref[i]           # (Sp, Sp) bf16
        p = bn2_ref[i]            # (3, Sp) f32: [bias, gamma, beta]
        y = jnp.dot(h.astype(jnp.bfloat16), w2,
                    preferred_element_type=jnp.float32) + p[0:1, :]
        y = _bn_relu_fused(y, p[1:2, :], p[2:3, :])
        return h + y

    h = jax.lax.fori_loop(0, nblk, block, h, unroll=True)

    out = jnp.dot(h.astype(jnp.bfloat16), lw_ref[...],
                  preferred_element_type=jnp.float32) + lb_ref[...]
    out_ref[...] = out.astype(out_ref.dtype)


def _stream_kernel(x_ref, fc1w_ref, fc1b_ref, bn1g_ref, bn1b_ref,
                   bw2_ref, bn2_ref, lw_ref, lb_ref, out_ref, h_ref):
    """One grid step per residual block; blk weights streamed, carry in f32 scratch."""
    i = pl.program_id(0)
    nblk = pl.num_programs(0)

    @pl.when(i == 0)
    def _():
        h0 = jnp.dot(x_ref[...], fc1w_ref[...],
                     preferred_element_type=jnp.float32) + fc1b_ref[...]
        h_ref[...] = _bn_relu_fused(h0, bn1g_ref[...], bn1b_ref[...])

    h = h_ref[...]
    p = bn2_ref[0]                # (3, Sp): [bias, gamma, beta] of block i
    y = jnp.dot(h.astype(jnp.bfloat16), bw2_ref[0],
                preferred_element_type=jnp.float32) + p[0:1, :]
    y = _bn_relu_fused(y, p[1:2, :], p[2:3, :])
    h_new = h + y
    h_ref[...] = h_new

    @pl.when(i == nblk - 1)
    def _():
        out = jnp.dot(h_new.astype(jnp.bfloat16), lw_ref[...],
                      preferred_element_type=jnp.float32) + lb_ref[...]
        out_ref[...] = out.astype(out_ref.dtype)


# ---------------------------------------------------------------------------
# Wrapper
# ---------------------------------------------------------------------------

def frame_decoder(x, params, *, force_stream=False, force_resident=False):
    B, L = x.shape
    S = params["fc1_w"].shape[1]
    O = params["last_w"].shape[1]
    nblocks = params["blk_w2"].shape[0]
    assert nblocks >= 1, "FrameDecoder kernel expects nblocks >= 1"

    Lp, Sp, Op = _round_up(L), _round_up(S), _round_up(O)
    bf16, f32 = jnp.bfloat16, jnp.float32

    def pad2(w, r, c):
        return jnp.pad(w, ((0, r - w.shape[0]), (0, c - w.shape[1])))

    def padrow(v, c):
        return jnp.pad(v, ((0, 0), (0, c - v.shape[1])))

    # Lane-aligned zero-padded operands.  Batch dim is NEVER padded (BN semantics).
    xp     = jnp.pad(x, ((0, 0), (0, Lp - L))).astype(bf16)
    fc1_w  = pad2(params["fc1_w"], Lp, Sp).astype(bf16)
    fc1_b  = padrow(params["fc1_b"], Sp).astype(f32)
    bn1_g  = padrow(params["bn1_g"], Sp).astype(f32)
    bn1_b  = padrow(params["bn1_b"], Sp).astype(f32)
    blk_w2 = jnp.pad(params["blk_w2"],
                     ((0, 0), (0, Sp - S), (0, Sp - S))).astype(bf16)
    # Pack per-block BN2 params into one (nblocks, 3, Sp) array: [bias, gamma, beta].
    bn2_packed = jnp.concatenate(
        [params["blk_b2"], params["blk_g2"], params["blk_beta2"]], axis=1)
    bn2_packed = jnp.pad(bn2_packed, ((0, 0), (0, 0), (0, Sp - S))).astype(f32)
    last_w = pad2(params["last_w"], Sp, Op).astype(bf16)
    last_b = padrow(params["last_b"], Op).astype(f32)

    # --- VMEM accounting (exact, no double counting) --------------------------------
    ceiling = _vmem_ceiling_bytes()
    bytes_invariant = (B * Lp * 2            # x (bf16)
                       + Lp * Sp * 2 + 3 * Sp * 4   # fc1_w + fc1_b/bn1_g/bn1_b
                       + Sp * Op * 2 + Op * 4)      # last_w + last_b
    bytes_block = Sp * Sp * 2 + 3 * Sp * 4          # one streamed block (bf16 w + f32 bn)
    bytes_act = 4 * B * Sp * 4                      # h/y temporaries headroom (f32)
    bytes_out = B * Op * 4

    resident_est = bytes_invariant + nblocks * bytes_block + bytes_act + bytes_out
    use_resident = (not force_stream) and (
        force_resident or resident_est <= max(4 * 1024 * 1024, ceiling // 8))

    if use_resident:
        vmem_limit = _clamp_vmem(resident_est * 3 // 2 + (2 << 20), ceiling)
        out_padded = pl.pallas_call(
            _resident_kernel,
            out_shape=jax.ShapeDtypeStruct((B, Op), jnp.float32),
            compiler_params=pltpu.CompilerParams(vmem_limit_bytes=vmem_limit),
        )(xp, fc1_w, fc1_b, bn1_g, bn1_b, blk_w2, bn2_packed, last_w, last_b)
    else:
        stream_est = (bytes_invariant            # single-buffered invariants
                      + 2 * bytes_block          # double-buffered streamed block
                      + 2 * bytes_out            # double-buffered output tile
                      + B * Sp * 4               # f32 residual-carry scratch
                      + bytes_act)
        vmem_limit = _clamp_vmem(stream_est * 3 // 2 + (2 << 20), ceiling)
        vmem_whole = pl.BlockSpec(memory_space=pltpu.MemorySpace.VMEM)  # single-buffered
        out_padded = pl.pallas_call(
            _stream_kernel,
            out_shape=jax.ShapeDtypeStruct((B, Op), jnp.float32),
            grid_spec=pltpu.PrefetchScalarGridSpec(
                num_scalar_prefetch=0,
                grid=(nblocks,),
                in_specs=[
                    vmem_whole,                                       # x
                    vmem_whole,                                       # fc1_w
                    vmem_whole,                                       # fc1_b
                    vmem_whole,                                       # bn1_g
                    vmem_whole,                                       # bn1_b
                    pl.BlockSpec((1, Sp, Sp), lambda i: (i, 0, 0)),   # blk_w2[i] streamed
                    pl.BlockSpec((1, 3, Sp), lambda i: (i, 0, 0)),    # packed bn2[i]
                    vmem_whole,                                       # last_w
                    vmem_whole,                                       # last_b
                ],
                out_specs=pl.BlockSpec((B, Op), lambda i: (0, 0)),
                scratch_shapes=[pltpu.VMEM((B, Sp), jnp.float32)],    # residual carry h
            ),
            compiler_params=pltpu.CompilerParams(
                dimension_semantics=("arbitrary",),   # sequential carry over blocks
                vmem_limit_bytes=vmem_limit,
            ),
        )(xp, fc1_w, fc1_b, bn1_g, bn1_b, blk_w2, bn2_packed, last_w, last_b)

    return out_padded[:, :O].astype(x.dtype)


# ---------------------------------------------------------------------------
# Pure-JAX references
# ---------------------------------------------------------------------------

def _bn_train_f32(v, gamma, beta):
    mu = jnp.mean(v, axis=0, keepdims=True)
    var = jnp.mean((v - mu) * (v - mu), axis=0, keepdims=True)
    return (v - mu) * jax.lax.rsqrt(var + EPS) * gamma + beta


def frame_decoder_ref(x, p):
    """Exact f32 mirror of the PyTorch forward (train-mode BN)."""
    h = x @ p["fc1_w"] + p["fc1_b"]
    h = jnp.maximum(_bn_train_f32(h, p["bn1_g"], p["bn1_b"]), 0.0)
    for i in range(p["blk_w2"].shape[0]):
        y = h @ p["blk_w2"][i] + p["blk_b2"][i]
        y = jnp.maximum(_bn_train_f32(y, p["blk_g2"][i], p["blk_beta2"][i]), 0.0)
        h = h + y
    return h @ p["last_w"] + p["last_b"]


def frame_decoder_ref_bf16(x, p):
    """Reference emulating the kernel's bf16-matmul / f32-accumulate numerics."""
    def mm(a, w):
        return jnp.dot(a.astype(jnp.bfloat16), w.astype(jnp.bfloat16),
                       preferred_element_type=jnp.float32)
    h = _bn_relu_fused(mm(x, p["fc1_w"]) + p["fc1_b"], p["bn1_g"], p["bn1_b"])
    for i in range(p["blk_w2"].shape[0]):
        y = _bn_relu_fused(mm(h, p["blk_w2"][i]) + p["blk_b2"][i],
                           p["blk_g2"][i], p["blk_beta2"][i])
        h = h + y
    return mm(h, p["last_w"]) + p["last_b"]


def init_params(key, latent_size, size, output_size, nblocks):
    ks = jax.random.split(key, 10)
    f32 = jnp.float32
    return {
        "fc1_w": 0.1 * jax.random.normal(ks[0], (latent_size, size), f32),
        "fc1_b": 0.1 * jax.random.normal(ks[1], (1, size), f32),
        "bn1_g": 1.0 + 0.05 * jax.random.normal(ks[2], (1, size), f32),
        "bn1_b": 0.05 * jax.random.normal(ks[3], (1, size), f32),
        "blk_w2": 0.1 * jax.random.normal(ks[4], (nblocks, size, size), f32),
        "blk_b2": 0.1 * jax.random.normal(ks[5], (nblocks, 1, size), f32),
        "blk_g2": 1.0 + 0.05 * jax.random.normal(ks[6], (nblocks, 1, size), f32),
        "blk_beta2": 0.05 * jax.random.normal(ks[7], (nblocks, 1, size), f32),
        "last_w": 0.1 * jax.random.normal(ks[8], (size, output_size), f32),
        "last_b": 0.1 * jax.random.normal(ks[9], (1, output_size), f32),
    }


if __name__ == "__main__":
    # FrameDecoder(latent_size=16, size=32, output_size=24, nblocks=2); many frames per call.
    latent_size, size, output_size, nblocks = 16, 32, 24, 2
    batch = 64

    key = jax.random.PRNGKey(0)
    kx, kp = jax.random.split(key)
    x = jax.random.normal(kx, (batch, latent_size), jnp.float32)
    params = init_params(kp, latent_size, size, output_size, nblocks)

    # Resident (auto-selected at these small shapes) and streamed (forced) paths.
    out_res = jax.block_until_ready(frame_decoder(x, params))
    out_str = jax.block_until_ready(frame_decoder(x, params, force_stream=True))

    ref_bf16 = jax.block_until_ready(frame_decoder_ref_bf16(x, params))
    ref_f32 = jax.block_until_ready(frame_decoder_ref(x, params))

    for out in (out_res, out_str):
        assert out.shape == (batch, output_size), out.shape
        # Tight check against a reference with the same bf16-matmul numerics.
        assert jnp.allclose(out, ref_bf16, atol=1e-2, rtol=1e-2), \
            float(jnp.max(jnp.abs(out - ref_bf16)))
        # Coarse check against the exact f32 PyTorch-semantics forward.
        assert jnp.allclose(out, ref_f32, atol=1e-1, rtol=1e-1), \
            float(jnp.max(jnp.abs(out - ref_f32)))
    # Both paths implement the same computation.
    assert jnp.allclose(out_res, out_str, atol=1e-3, rtol=1e-3), \
        float(jnp.max(jnp.abs(out_res - out_str)))
    print("KERNEL_OK")
</pallas_src>

<mosaic_0001>
module attributes {stable_mosaic.version = 11 : i64} {
  func.func @_resident_kernel(%arg0: memref<64x128xbf16, #tpu.memory_space<vmem>>, %arg1: memref<128x128xbf16, #tpu.memory_space<vmem>>, %arg2: memref<1x128xf32, #tpu.memory_space<vmem>>, %arg3: memref<1x128xf32, #tpu.memory_space<vmem>>, %arg4: memref<1x128xf32, #tpu.memory_space<vmem>>, %arg5: memref<2x128x128xbf16, #tpu.memory_space<vmem>>, %arg6: memref<2x3x128xf32, #tpu.memory_space<vmem>>, %arg7: memref<128x128xbf16, #tpu.memory_space<vmem>>, %arg8: memref<1x128xf32, #tpu.memory_space<vmem>>, %arg9: memref<64x128xf32, #tpu.memory_space<vmem>>) attributes {dimension_semantics = [], scalar_prefetch = 0 : i64, scratch_operands = 0 : i64, tpu.core_type = #tpu.core_type<tc>} {
    %c0 = arith.constant 0 : index
    %c0_0 = arith.constant 0 : index
    %0 = vector.load %arg0[%c0, %c0_0] : memref<64x128xbf16, #tpu.memory_space<vmem>>, vector<64x128xbf16>
    %c0_1 = arith.constant 0 : index
    %c0_2 = arith.constant 0 : index
    %1 = vector.load %arg1[%c0_1, %c0_2] : memref<128x128xbf16, #tpu.memory_space<vmem>>, vector<128x128xbf16>
    %cst = arith.constant dense<0.000000e+00> : vector<64x128xf32>
    %2 = tpu.matmul %0, %1, %cst {dimension_numbers = #tpu.dot_dimension_numbers<[1], [0], [0], [1], [0, 0, 1, 1], [], []>} : vector<64x128xbf16>, vector<128x128xbf16>, vector<64x128xf32> -> vector<64x128xf32>
    %c0_3 = arith.constant 0 : index
    %c0_4 = arith.constant 0 : index
    %3 = vector.load %arg2[%c0_3, %c0_4] : memref<1x128xf32, #tpu.memory_space<vmem>>, vector<1x128xf32>
    %4 = vector.broadcast %3 : vector<1x128xf32> to vector<64x128xf32>
    %5 = arith.addf %2, %4 : vector<64x128xf32>
    %c0_5 = arith.constant 0 : index
    %c0_6 = arith.constant 0 : index
    %6 = vector.load %arg3[%c0_5, %c0_6] : memref<1x128xf32, #tpu.memory_space<vmem>>, vector<1x128xf32>
    %c0_7 = arith.constant 0 : index
    %c0_8 = arith.constant 0 : index
    %7 = vector.load %arg4[%c0_7, %c0_8] : memref<1x128xf32, #tpu.memory_space<vmem>>, vector<1x128xf32>
    %cst_9 = arith.constant dense<0.000000e+00> : vector<128xf32>
    %8 = vector.multi_reduction <add>, %5, %cst_9 [0] : vector<64x128xf32> to vector<128xf32>
    %9 = vector.shape_cast %8 : vector<128xf32> to vector<1x128xf32>
    %cst_10 = arith.constant 1.562500e-02 : f32
    %10 = vector.broadcast %cst_10 : f32 to vector<1x128xf32>
    %11 = arith.mulf %9, %10 : vector<1x128xf32>
    %12 = vector.broadcast %11 : vector<1x128xf32> to vector<64x128xf32>
    %13 = arith.subf %5, %12 : vector<64x128xf32>
    %14 = arith.mulf %13, %13 : vector<64x128xf32>
    %cst_11 = arith.constant dense<0.000000e+00> : vector<128xf32>
    %15 = vector.multi_reduction <add>, %14, %cst_11 [0] : vector<64x128xf32> to vector<128xf32>
    %16 = vector.shape_cast %15 : vector<128xf32> to vector<1x128xf32>
    %cst_12 = arith.constant 1.562500e-02 : f32
    %17 = vector.broadcast %cst_12 : f32 to vector<1x128xf32>
    %18 = arith.mulf %16, %17 : vector<1x128xf32>
    %cst_13 = arith.constant 9.99999974E-6 : f32
    %19 = vector.broadcast %cst_13 : f32 to vector<1x128xf32>
    %20 = arith.addf %18, %19 : vector<1x128xf32>
    %21 = math.rsqrt %20 : vector<1x128xf32>
    %22 = arith.mulf %6, %21 : vector<1x128xf32>
    %23 = vector.broadcast %22 : vector<1x128xf32> to vector<64x128xf32>
    %24 = arith.mulf %13, %23 : vector<64x128xf32>
    %25 = vector.broadcast %7 : vector<1x128xf32> to vector<64x128xf32>
    %26 = arith.addf %24, %25 : vector<64x128xf32>
    %cst_14 = arith.constant 0.000000e+00 : f32
    %27 = vector.broadcast %cst_14 : f32 to vector<64x128xf32>
    %28 = arith.maximumf %26, %27 : vector<64x128xf32>
    %c0_i32 = arith.constant 0 : i32
    %29 = arith.index_cast %c0_i32 : i32 to index
    %c0_15 = arith.constant 0 : index
    %c0_16 = arith.constant 0 : index
    %30 = vector.load %arg5[%29, %c0_15, %c0_16] : memref<2x128x128xbf16, #tpu.memory_space<vmem>>, vector<1x128x128xbf16>
    %31 = vector.shape_cast %30 : vector<1x128x128xbf16> to vector<128x128xbf16>
    %32 = arith.index_cast %c0_i32 : i32 to index
    %c0_17 = arith.constant 0 : index
    %c0_18 = arith.constant 0 : index
    %33 = vector.load %arg6[%32, %c0_17, %c0_18] : memref<2x3x128xf32, #tpu.memory_space<vmem>>, vector<1x3x128xf32>
    %34 = vector.shape_cast %33 : vector<1x3x128xf32> to vector<3x128xf32>
    %35 = arith.truncf %28 : vector<64x128xf32> to vector<64x128xbf16>
    %cst_19 = arith.constant dense<0.000000e+00> : vector<64x128xf32>
    %36 = tpu.matmul %35, %31, %cst_19 {dimension_numbers = #tpu.dot_dimension_numbers<[1], [0], [0], [1], [0, 0, 1, 1], [], []>} : vector<64x128xbf16>, vector<128x128xbf16>, vector<64x128xf32> -> vector<64x128xf32>
    %37 = vector.extract_strided_slice %34 {offsets = [0, 0], sizes = [1, 128], strides = [1, 1]} : vector<3x128xf32> to vector<1x128xf32>
    %38 = vector.broadcast %37 : vector<1x128xf32> to vector<64x128xf32>
    %39 = arith.addf %36, %38 : vector<64x128xf32>
    %40 = vector.extract_strided_slice %34 {offsets = [1, 0], sizes = [1, 128], strides = [1, 1]} : vector<3x128xf32> to vector<1x128xf32>
    %41 = vector.extract_strided_slice %34 {offsets = [2, 0], sizes = [1, 128], strides = [1, 1]} : vector<3x128xf32> to vector<1x128xf32>
    %cst_20 = arith.constant dense<0.000000e+00> : vector<128xf32>
    %42 = vector.multi_reduction <add>, %39, %cst_20 [0] : vector<64x128xf32> to vector<128xf32>
    %43 = vector.shape_cast %42 : vector<128xf32> to vector<1x128xf32>
    %cst_21 = arith.constant 1.562500e-02 : f32
    %44 = vector.broadcast %cst_21 : f32 to vector<1x128xf32>
    %45 = arith.mulf %43, %44 : vector<1x128xf32>
    %46 = vector.broadcast %45 : vector<1x128xf32> to vector<64x128xf32>
    %47 = arith.subf %39, %46 : vector<64x128xf32>
    %48 = arith.mulf %47, %47 : vector<64x128xf32>
    %cst_22 = arith.constant dense<0.000000e+00> : vector<128xf32>
    %49 = vector.multi_reduction <add>, %48, %cst_22 [0] : vector<64x128xf32> to vector<128xf32>
    %50 = vector.shape_cast %49 : vector<128xf32> to vector<1x128xf32>
    %cst_23 = arith.constant 1.562500e-02 : f32
    %51 = vector.broadcast %cst_23 : f32 to vector<1x128xf32>
    %52 = arith.mulf %50, %51 : vector<1x128xf32>
    %cst_24 = arith.constant 9.99999974E-6 : f32
    %53 = vector.broadcast %cst_24 : f32 to vector<1x128xf32>
    %54 = arith.addf %52, %53 : vector<1x128xf32>
    %55 = math.rsqrt %54 : vector<1x128xf32>
    %56 = arith.mulf %40, %55 : vector<1x128xf32>
    %57 = vector.broadcast %56 : vector<1x128xf32> to vector<64x128xf32>
    %58 = arith.mulf %47, %57 : vector<64x128xf32>
    %59 = vector.broadcast %41 : vector<1x128xf32> to vector<64x128xf32>
    %60 = arith.addf %58, %59 : vector<64x128xf32>
    %cst_25 = arith.constant 0.000000e+00 : f32
    %61 = vector.broadcast %cst_25 : f32 to vector<64x128xf32>
    %62 = arith.maximumf %60, %61 : vector<64x128xf32>
    %63 = arith.addf %28, %62 : vector<64x128xf32>
    %c1_i32 = arith.constant 1 : i32
    %64 = arith.index_cast %c1_i32 : i32 to index
    %c0_26 = arith.constant 0 : index
    %c0_27 = arith.constant 0 : index
    %65 = vector.load %arg5[%64, %c0_26, %c0_27] : memref<2x128x128xbf16, #tpu.memory_space<vmem>>, vector<1x128x128xbf16>
    %66 = vector.shape_cast %65 : vector<1x128x128xbf16> to vector<128x128xbf16>
    %67 = arith.index_cast %c1_i32 : i32 to index
    %c0_28 = arith.constant 0 : index
    %c0_29 = arith.constant 0 : index
    %68 = vector.load %arg6[%67, %c0_28, %c0_29] : memref<2x3x128xf32, #tpu.memory_space<vmem>>, vector<1x3x128xf32>
    %69 = vector.shape_cast %68 : vector<1x3x128xf32> to vector<3x128xf32>
    %70 = arith.truncf %63 : vector<64x128xf32> to vector<64x128xbf16>
    %cst_30 = arith.constant dense<0.000000e+00> : vector<64x128xf32>
    %71 = tpu.matmul %70, %66, %cst_30 {dimension_numbers = #tpu.dot_dimension_numbers<[1], [0], [0], [1], [0, 0, 1, 1], [], []>} : vector<64x128xbf16>, vector<128x128xbf16>, vector<64x128xf32> -> vector<64x128xf32>
    %72 = vector.extract_strided_slice %69 {offsets = [0, 0], sizes = [1, 128], strides = [1, 1]} : vector<3x128xf32> to vector<1x128xf32>
    %73 = vector.broadcast %72 : vector<1x128xf32> to vector<64x128xf32>
    %74 = arith.addf %71, %73 : vector<64x128xf32>
    %75 = vector.extract_strided_slice %69 {offsets = [1, 0], sizes = [1, 128], strides = [1, 1]} : vector<3x128xf32> to vector<1x128xf32>
    %76 = vector.extract_strided_slice %69 {offsets = [2, 0], sizes = [1, 128], strides = [1, 1]} : vector<3x128xf32> to vector<1x128xf32>
    %cst_31 = arith.constant dense<0.000000e+00> : vector<128xf32>
    %77 = vector.multi_reduction <add>, %74, %cst_31 [0] : vector<64x128xf32> to vector<128xf32>
    %78 = vector.shape_cast %77 : vector<128xf32> to vector<1x128xf32>
    %cst_32 = arith.constant 1.562500e-02 : f32
    %79 = vector.broadcast %cst_32 : f32 to vector<1x128xf32>
    %80 = arith.mulf %78, %79 : vector<1x128xf32>
    %81 = vector.broadcast %80 : vector<1x128xf32> to vector<64x128xf32>
    %82 = arith.subf %74, %81 : vector<64x128xf32>
    %83 = arith.mulf %82, %82 : vector<64x128xf32>
    %cst_33 = arith.constant dense<0.000000e+00> : vector<128xf32>
    %84 = vector.multi_reduction <add>, %83, %cst_33 [0] : vector<64x128xf32> to vector<128xf32>
    %85 = vector.shape_cast %84 : vector<128xf32> to vector<1x128xf32>
    %cst_34 = arith.constant 1.562500e-02 : f32
    %86 = vector.broadcast %cst_34 : f32 to vector<1x128xf32>
    %87 = arith.mulf %85, %86 : vector<1x128xf32>
    %cst_35 = arith.constant 9.99999974E-6 : f32
    %88 = vector.broadcast %cst_35 : f32 to vector<1x128xf32>
    %89 = arith.addf %87, %88 : vector<1x128xf32>
    %90 = math.rsqrt %89 : vector<1x128xf32>
    %91 = arith.mulf %75, %90 : vector<1x128xf32>
    %92 = vector.broadcast %91 : vector<1x128xf32> to vector<64x128xf32>
    %93 = arith.mulf %82, %92 : vector<64x128xf32>
    %94 = vector.broadcast %76 : vector<1x128xf32> to vector<64x128xf32>
    %95 = arith.addf %93, %94 : vector<64x128xf32>
    %cst_36 = arith.constant 0.000000e+00 : f32
    %96 = vector.broadcast %cst_36 : f32 to vector<64x128xf32>
    %97 = arith.maximumf %95, %96 : vector<64x128xf32>
    %98 = arith.addf %63, %97 : vector<64x128xf32>
    %c2_i32 = arith.constant 2 : i32
    %99 = arith.truncf %98 : vector<64x128xf32> to vector<64x128xbf16>
    %c0_37 = arith.constant 0 : index
    %c0_38 = arith.constant 0 : index
    %100 = vector.load %arg7[%c0_37, %c0_38] : memref<128x128xbf16, #tpu.memory_space<vmem>>, vector<128x128xbf16>
    %cst_39 = arith.constant dense<0.000000e+00> : vector<64x128xf32>
    %101 = tpu.matmul %99, %100, %cst_39 {dimension_numbers = #tpu.dot_dimension_numbers<[1], [0], [0], [1], [0, 0, 1, 1], [], []>} : vector<64x128xbf16>, vector<128x128xbf16>, vector<64x128xf32> -> vector<64x128xf32>
    %c0_40 = arith.constant 0 : index
    %c0_41 = arith.constant 0 : index
    %102 = vector.load %arg8[%c0_40, %c0_41] : memref<1x128xf32, #tpu.memory_space<vmem>>, vector<1x128xf32>
    %103 = vector.broadcast %102 : vector<1x128xf32> to vector<64x128xf32>
    %104 = arith.addf %101, %103 : vector<64x128xf32>
    %c0_42 = arith.constant 0 : index
    %c0_43 = arith.constant 0 : index
    %105 = vector.load %arg9[%c0_42, %c0_43] : memref<64x128xf32, #tpu.memory_space<vmem>>, vector<64x128xf32>
    tpu.vector_store %arg9[%c0_42, %c0_43], %104 {strides = array<i32>} : memref<64x128xf32, #tpu.memory_space<vmem>>, vector<64x128xf32>,
    return
  }
}

</mosaic_0001>

<bundles_post_ra>
// kernel: tpu_custom_call.1
= control target key start
LH: loop header
LB: loop body
LE: loop exit
PB: predicated region body
PF: predicated region fallthrough
CT: control target
= control target key end

     0   :  { %14 = vsyncpa [#allocation3], 0  ;;  %s1400_s0 = inlined_call_operand.hbm [shape: bf16[64,128], index: 0, kind: input, shape index: {}]   ;;  %s1401_s1 = inlined_call_operand.hbm [shape: bf16[128,128], index: 1, kind: input, shape index: {}]   ;;  %s1402_s2 = inlined_call_operand.vmem [shape: f32[1,128], index: 2, kind: input, shape index: {}]   ;;  %s1403_s3 = inlined_call_operand.vmem [shape: f32[1,128], index: 3, kind: input, shape index: {}]   ;;  %s1404_s4 = inlined_call_operand.vmem [shape: f32[1,128], index: 4, kind: input, shape index: {}]   ;;  %s1405_s5 = inlined_call_operand.hbm [shape: bf16[2,128,128], index: 5, kind: input, shape index: {}]   ;;  %s1406_s6 = inlined_call_operand.vmem [shape: f32[2,3,128], index: 6, kind: input, shape index: {}]   ;;  %s1407_s7 = inlined_call_operand.hbm [shape: bf16[128,128], index: 7, kind: input, shape index: {}]   ;;  %s1408_s8 = inlined_call_operand.vmem [shape: f32[1,128], index: 8, kind: input, shape index: {}]   ;;  %s1409_s9 = inlined_call_operand.hbm [shape: f32[64,128], index: 9, kind: output, shape index: {}]  }
   0x1   :  { %15 = vsyncpa [#allocation6], 0 }
   0x2   :  { %16 = vsyncpa [#allocation9], 0 }
   0x3   :  { %17 = vsyncpa [#allocation4], 0  ;;  %s35_s11 = sshll.u32 %s1401_s1, 4  ;;  %s1150_s12 = smov [#allocation5]   ;;  %s36_s11 = int_to_ptr.hbm [resolvable:$true] %s35_s11 }
   0x4   :  { %s37_s13 = sshll.u32 %s1150_s12, 4  ;;  %s22_s16 = sshll.u32 %s1400_s0, 4  ;;  %s38_s13 = int_to_ptr.vmem [resolvable:$true] %s37_s13  ;;  %s23_s16 = int_to_ptr.hbm [resolvable:$true] %s22_s16 }
   0x5   :  { %s1151_s17 = smov 64   ;;  %s1152_s18 = smov 4  }
   0x6   :  { %43 = dma.hbm_to_vmem [thread:$0]  %s36_s11, 1024, %s38_s13, [#allocation6], %s1151_s17, %s1151_s17, %s1152_s18  }
   0x7   :  { %s1153_s19 = smov [#allocation2]   ;;  %s54_s23 = sshll.u32 %s1405_s5, 4  ;;  %s55_s23 = int_to_ptr.hbm [resolvable:$true] %s54_s23 }
   0x8   :  { %s24_s20 = sshll.u32 %s1153_s19, 4  ;;  %s69_s25 = sshll.u32 %s1407_s7, 4  ;;  %s25_s20 = int_to_ptr.vmem [resolvable:$true] %s24_s20  ;;  %s70_s25 = int_to_ptr.hbm [resolvable:$true] %s69_s25 }
   0x9   :  { %30 = dma.hbm_to_vmem [thread:$0]  %s23_s16, 512, %s25_s20, [#allocation3], %s1151_s17, %s1151_s17, %s1152_s18  }
   0xa   :  { %s1154_s26 = smov [#allocation7]   ;;  %s1155_s0 = smov [#allocation8]  }
   0xb   :  { %s56_s27 = sshll.u32 %s1154_s26, 4  ;;  %s71_s28 = sshll.u32 %s1155_s0, 4  ;;  %s57_s27 = int_to_ptr.vmem [resolvable:$true] %s56_s27  ;;  %s72_s28 = int_to_ptr.vmem [resolvable:$true] %s71_s28 }
   0xc   :  { %62 = dma.hbm_to_vmem [thread:$0]  %s55_s23, 2048, %s57_s27, [#allocation6], %s1151_s17, %s1151_s17, %s1152_s18  }
   0xd   :  { %77 = dma.hbm_to_vmem [thread:$0]  %s70_s25, 1024, %s72_s28, [#allocation9], %s1151_s17, %s1151_s17, %s1152_s18  }
   0xe   :  { %1142 = dma.done.wait [#allocation3], 512  }
   0xf   :  { %1143 = vsyncadd [#allocation3], 4294966784 }
  0x10   :  { %1144 = dma.done.wait [#allocation6], 3072  }
  0x11   :  { %1145 = vsyncadd [#allocation6], 4294964224 }
  0x12   :  { %1146 = dma.done.wait [#allocation9], 1024  }
  0x13   :  { %1147 = vsyncadd [#allocation9], 4294966272  ;;  %v979_v0 = vld [vmem:[#allocation5 + $0x38] sm:$0xff]  ;;  %v978_v1 = vld [vmem:[#allocation5 + $0x30] sm:$0xff]  ;;  %s808_s17 = sshll.u32 %s1409_s9, 4  ;;  %s1157_s18 = smov 128   ;;  %s809_s17 = int_to_ptr.hbm [resolvable:$true] %s808_s17 }
  0x14   :  { %196 = vmatpush.bf16.msra.mxu0 %v979_v0  ;;  %v977_v2 = vld [vmem:[#allocation5 + $0x28] sm:$0xff]  ;;  %v976_v3 = vld [vmem:[#allocation5 + $0x20] sm:$0xff]  ;;  %v975_v4 = vld [vmem:[#allocation5 + $0x18] sm:$0xff]  ;;  %s1158_s19 = smov 8  }
  0x15   :  { %v974_v5 = vld [vmem:[#allocation5 + $0x10] sm:$0xff]  ;;  %v973_v6 = vld [vmem:[#allocation5 + $0x8] sm:$0xff]  ;;  %v972_v7 = vld [vmem:[#allocation5] sm:$0xff] }
  0x16   :  { %v968_v8 = vld [vmem:[#allocation2] sm:$0xff]  ;;  %v969_v9 = vld [vmem:[#allocation2 + $0x8] sm:$0xff]  ;;  %v970_v10 = vld [vmem:[#allocation2 + $0x10] sm:$0xff] }
  0x17   :  { %v971_v11 = vld [vmem:[#allocation2 + $0x18] sm:$0xff]  ;;  %v1013_v18 = vld [vmem:[%s1402_s2] ss:$0 sm:$0xff]  ;;  %v986_v53 = vld [vmem:[#allocation7 + $0x30] sm:$0xff] }
  0x18   :  { %197 = vmatpush.bf16.msra.mxu0 %v978_v1  ;;  %v987_v46 = vld [vmem:[#allocation7 + $0x38] sm:$0xff]  ;;  %v985_v60 = vld [vmem:[#allocation7 + $0x28] sm:$0xff] }
  0x19   :  { %383 = vmatpush.bf16.msra.mxu1 %v987_v46 }
  0x1c   :  { %198 = vmatpush.bf16.msra.mxu0 %v977_v2  ;;  %v984_v2 = vld [vmem:[#allocation7 + $0x20] sm:$0xff] }
  0x1d   :  { %384 = vmatpush.bf16.msra.mxu1 %v986_v53 }
  0x20   :  { %199 = vmatpush.bf16.msra.mxu0 %v976_v3 }
  0x21   :  { %385 = vmatpush.bf16.msra.mxu1 %v985_v60 }
  0x24   :  { %200 = vmatpush.bf16.msra.mxu0 %v975_v4 }
  0x25   :  { %386 = vmatpush.bf16.msra.mxu1 %v984_v2 }
  0x28   :  { %201 = vmatpush.bf16.msra.mxu0 %v974_v5 }
  0x2c   :  { %202 = vmatpush.bf16.msra.mxu0 %v973_v6  ;;  %v983_v6 = vld [vmem:[#allocation7 + $0x18] sm:$0xff] }
  0x2d   :  { %387 = vmatpush.bf16.msra.mxu1 %v983_v6 }
  0x30   :  { %203 = vmatpush.bf16.msra.mxu0 %v972_v7 }
  0x33   :  { %204 = vmatmul.bf16.vlgmr.msra.gmra.mxu0 %v968_v8 }
  0x43   :  { %209 = vmatmul.bf16.gmra.mxu0 %v969_v9  ;;  %v982_v9 = vld [vmem:[#allocation7 + $0x10] sm:$0xff] }
  0x44   :  { %388 = vmatpush.bf16.msra.mxu1 %v982_v9 }
  0x53   :  { %214 = vmatmul.bf16.gmra.mxu0 %v970_v10 }
  0x63   :  { %219 = vmatmul.bf16.gmra.mxu0 %v971_v11 }
  0xb0   :  { %v205_v12 = vpop.f32.mrf.mxu0 }
  0xb1   :  { %v206_v20 = vadd.f32 %v1013_v18, %v205_v12  ;;  %v981_v12 = vld [vmem:[#allocation7 + $0x8] sm:$0xff] }
  0xb2   :  { %389 = vmatpush.bf16.msra.mxu1 %v981_v12 }
  0xb8   :  { %v207_v13 = vpop.f32.mrf.mxu0 }
  0xb9   :  { %v208_v19 = vadd.f32 %v1013_v18, %v207_v13 }
  0xbb   :  { %v227_v22 = vadd.f32 %v208_v19, %v206_v20 }
  0xc0   :  { %v210_v14 = vpop.f32.mrf.mxu0 }
  0xc1   :  { %v211_v21 = vadd.f32 %v1013_v18, %v210_v14  ;;  %v980_v14 = vld [vmem:[#allocation7] sm:$0xff] }
  0xc2   :  { %390 = vmatpush.bf16.msra.mxu1 %v980_v14 }
  0xc3   :  { %v228_v25 = vadd.f32 %v227_v22, %v211_v21 }
  0xc8   :  { %v212_v15 = vpop.f32.mrf.mxu0 }
  0xc9   :  { %v213_v23 = vadd.f32 %v1013_v18, %v212_v15 }
  0xcb   :  { %v229_v27 = vadd.f32 %v228_v25, %v213_v23 }
  0xd0   :  { %v215_v16 = vpop.f32.mrf.mxu0 }
  0xd1   :  { %v216_v26 = vadd.f32 %v1013_v18, %v215_v16 }
  0xd3   :  { %v230_v29 = vadd.f32 %v229_v27, %v216_v26 }
  0xd8   :  { %v217_v17 = vpop.f32.mrf.mxu0 }
  0xd9   :  { %v218_v28 = vadd.f32 %v1013_v18, %v217_v17 }
  0xdb   :  { %v231_v31 = vadd.f32 %v230_v29, %v218_v28 }
  0xe0   :  { %v220_v24 = vpop.f32.mrf.mxu0 }
  0xe1   :  { %v221_v30 = vadd.f32 %v1013_v18, %v220_v24 }
  0xe3   :  { %v232_v33 = vadd.f32 %v231_v31, %v221_v30 }
  0xe8   :  { %v222_v32 = vpop.f32.mrf.mxu0 }
  0xe9   :  { %v223_v34 = vadd.f32 %v1013_v18, %v222_v32 }
  0xeb   :  { %v233_v35 = vadd.f32 %v232_v33, %v223_v34 }
  0xed   :  { %v234_v36 = vrot.slane %v233_v35, 4 }
  0xef   :  { %v235_v37 = vadd.f32 %v234_v36, %v233_v35 }
  0xf1   :  { %v236_v38 = vrot.slane %v235_v37, 2 }
  0xf3   :  { %v237_v39 = vadd.f32 %v236_v38, %v235_v37 }
  0xf5   :  { %v238_v40 = vrot.slane %v237_v39, 1 }
  0xf7   :  { %v239_v41 = vadd.f32 %v238_v40, %v237_v39 }
  0xf9   :  { %v240_v42 = vmul.f32 0.015625, %v239_v41 }
  0xfb   :  { %v241_v43 = vsub.f32 %v206_v20, %v240_v42  ;;  %v242_v44 = vsub.f32 %v208_v19, %v240_v42  ;;  %v1224_v45 = vsub.f32 %v211_v21, %v240_v42  ;;  %v1226_v47 = vsub.f32 %v213_v23, %v240_v42  ;;  %v225_v23 = vld [vmem:[%s1403_s3] sm:$0x1] }
  0xfc   :  { %v1228_v50 = vsub.f32 %v216_v26, %v240_v42  ;;  %v1232_v54 = vsub.f32 %v218_v28, %v240_v42  ;;  %v1236_v57 = vsub.f32 %v221_v30, %v240_v42  ;;  %v1240_v61 = vsub.f32 %v223_v34, %v240_v42  ;;  %v1014_v28 = vld [vmem:[%s1404_s4] ss:$0 sm:$0xff] }
  0xfd   :  { %v249_v48 = vmul.f32 %v241_v43, %v241_v43  ;;  %v250_v49 = vmul.f32 %v242_v44, %v242_v44  ;;  %v251_v51 = vmul.f32 %v1224_v45, %v1224_v45  ;;  %v252_v55 = vmul.f32 %v1226_v47, %v1226_v47 }
  0xfe   :  { %v253_v58 = vmul.f32 %v1228_v50, %v1228_v50  ;;  %v254_v62 = vmul.f32 %v1232_v54, %v1232_v54  ;;  %v255_v0 = vmul.f32 %v1236_v57, %v1236_v57  ;;  %v256_v3 = vmul.f32 %v1240_v61, %v1240_v61 }
  0xff   :  { %v257_v52 = vadd.f32 %v250_v49, %v249_v48 }
 0x101   :  { %v258_v56 = vadd.f32 %v257_v52, %v251_v51 }
 0x103   :  { %v259_v59 = vadd.f32 %v258_v56, %v252_v55 }
 0x105   :  { %v260_v63 = vadd.f32 %v259_v59, %v253_v58 }
 0x107   :  { %v261_v1 = vadd.f32 %v260_v63, %v254_v62 }
 0x109   :  { %v262_v4 = vadd.f32 %v261_v1, %v255_v0 }
 0x10b   :  { %v263_v5 = vadd.f32 %v262_v4, %v256_v3 }
 0x10d   :  { %v264_v7 = vrot.slane %v263_v5, 4 }
 0x10f   :  { %v265_v8 = vadd.f32 %v264_v7, %v263_v5 }
 0x111   :  { %v266_v10 = vrot.slane %v265_v8, 2 }
 0x113   :  { %v267_v11 = vadd.f32 %v266_v10, %v265_v8 }
 0x115   :  { %v268_v13 = vrot.slane %v267_v11, 1 }
 0x117   :  { %v269_v15 = vadd.f32 %v268_v13, %v267_v11 }
 0x119   :  { %v270_v16 = vmul.f32 0.015625, %v269_v15 }
 0x11b   :  { %v271_v17 = vadd.f32 1e-05, %v270_v16 }
 0x11d   :  { %1016 = vrsqrt.f32 %v271_v17  ;;  %vm278_vm1 = vweird.f32 %v271_v17 }
 0x123   :  { %v1017_v18 = vpop.eup %1016 }
 0x124   :  { %v273_v19 = vmul.f32 %v1017_v18, %v271_v17  ;;  %vm279_vm0 = vweird.f32 %v1017_v18 }
 0x125   :  { %vm280_vm2 = vmor %vm278_vm1, %vm279_vm0 }
 0x126   :  { %v274_v20 = vmul.f32 %v1017_v18, %v273_v19 }
 0x128   :  { %v275_v21 = vmul.f32 0.5, %v274_v20 }
 0x12a   :  { %v276_v22 = vsub.f32 1.5, %v275_v21 }
 0x12c   :  { %v277_v24 = vmul.f32 %v1017_v18, %v276_v22 }
 0x12e   :  { %v281_v25 = vsel %vm280_vm2, %v1017_v18, %v277_v24 }
 0x12f   :  { %v282_v26 = vmul.f32 %v281_v25, %v225_v23 }
 0x131   :  { %v284_v27 = vperm.slane %v282_v26, 0 }
 0x133   :  { %v286_v29 = vmul.f32 %v284_v27, %v241_v43  ;;  %v287_v30 = vmul.f32 %v284_v27, %v242_v44  ;;  %v288_v36 = vmul.f32 %v284_v27, %v1224_v45  ;;  %v289_v37 = vmul.f32 %v284_v27, %v1226_v47 }
 0x134   :  { %v290_v43 = vmul.f32 %v284_v27, %v1228_v50  ;;  %v291_v44 = vmul.f32 %v284_v27, %v1232_v54  ;;  %v293_v51 = vmul.f32 %v284_v27, %v1240_v61  ;;  %v292_v50 = vmul.f32 %v284_v27, %v1236_v57  ;;  %v1303_v57 = vld [vmem:[%s1406_s6] sm:$0x7] }
 0x135   :  { %v1254_v31 = vadd.f32 %v1014_v28, %v286_v29  ;;  %v1256_v32 = vadd.f32 %v1014_v28, %v287_v30  ;;  %v1266_v38 = vadd.f32 %v1014_v28, %v288_v36  ;;  %v1268_v39 = vadd.f32 %v1014_v28, %v289_v37 }
 0x136   :  { %v1278_v45 = vadd.f32 %v1014_v28, %v290_v43  ;;  %v1280_v46 = vadd.f32 %v1014_v28, %v291_v44  ;;  %v1290_v52 = vadd.f32 %v1014_v28, %v292_v50  ;;  %v1292_v53 = vadd.f32 %v1014_v28, %v293_v51  ;;  %v994_v51 = vld [vmem:[#allocation7 + $0x70] sm:$0xff] }
 0x137   :  { %v305_v33 = vmax.f32 %v1254_v31, 0.0  ;;  %v306_v34 = vmax.f32 %v1256_v32, 0.0  ;;  %v307_v40 = vmax.f32 %v1266_v38, 0.0  ;;  %v308_v41 = vmax.f32 %v1268_v39, 0.0 }
 0x138   :  { %v309_v47 = vmax.f32 %v1278_v45, 0.0  ;;  %v310_v48 = vmax.f32 %v1280_v46, 0.0  ;;  %v311_v54 = vmax.f32 %v1290_v52, 0.0  ;;  %v312_v55 = vmax.f32 %v1292_v53, 0.0 }
 0x139   :  { %v330_v35 = vpack.c.bf16 %v306_v34, %v305_v33  ;;  %v331_v42 = vpack.c.bf16 %v308_v41, %v307_v40  ;;  %v334_v0 = vperm.slane %v1303_v57, 0 }
 0x13a   :  { %v332_v49 = vpack.c.bf16 %v310_v48, %v309_v47  ;;  %v333_v56 = vpack.c.bf16 %v312_v55, %v311_v54 }
 0x13b   :  { %391 = vmatmul.bf16.vlgmr.msra.gmra.mxu1 %v330_v35  ;;  %v995_v35 = vld [vmem:[#allocation7 + $0x78] sm:$0xff] }
 0x13c   :  { %574 = vmatpush.bf16.msra.mxu2 %v995_v35 }
 0x140   :  { %575 = vmatpush.bf16.msra.mxu2 %v994_v51 }
 0x14b   :  { %396 = vmatmul.bf16.gmra.mxu1 %v331_v42 }
 0x15b   :  { %401 = vmatmul.bf16.gmra.mxu1 %v332_v49 }
 0x16b   :  { %406 = vmatmul.bf16.gmra.mxu1 %v333_v56 }
 0x1b8   :  { %v392_v58 = vpop.f32.mrf.mxu1 }
 0x1b9   :  { %v393_v2 = vadd.f32 %v392_v58, %v334_v0 }
 0x1c0   :  { %v394_v59 = vpop.f32.mrf.mxu1 }
 0x1c1   :  { %v395_v1 = vadd.f32 %v394_v59, %v334_v0 }
 0x1c3   :  { %v412_v4 = vadd.f32 %v395_v1, %v393_v2 }
 0x1c8   :  { %v397_v60 = vpop.f32.mrf.mxu1 }
 0x1c9   :  { %v398_v3 = vadd.f32 %v397_v60, %v334_v0 }
 0x1cb   :  { %v413_v7 = vadd.f32 %v412_v4, %v398_v3 }
 0x1d0   :  { %v399_v61 = vpop.f32.mrf.mxu1 }
 0x1d1   :  { %v400_v5 = vadd.f32 %v399_v61, %v334_v0 }
 0x1d3   :  { %v414_v9 = vadd.f32 %v413_v7, %v400_v5 }
 0x1d8   :  { %v402_v62 = vpop.f32.mrf.mxu1 }
 0x1d9   :  { %v403_v8 = vadd.f32 %v402_v62, %v334_v0  ;;  %v993_v62 = vld [vmem:[#allocation7 + $0x68] sm:$0xff] }
 0x1da   :  { %576 = vmatpush.bf16.msra.mxu2 %v993_v62 }
 0x1db   :  { %v415_v11 = vadd.f32 %v414_v9, %v403_v8  ;;  %v990_v9 = vld [vmem:[#allocation7 + $0x50] sm:$0xff] }
 0x1e0   :  { %v404_v63 = vpop.f32.mrf.mxu1 }
 0x1e1   :  { %v405_v10 = vadd.f32 %v404_v63, %v334_v0 }
 0x1e3   :  { %v416_v13 = vadd.f32 %v415_v11, %v405_v10  ;;  %v989_v11 = vld [vmem:[#allocation7 + $0x48] sm:$0xff] }
 0x1e8   :  { %v407_v6 = vpop.f32.mrf.mxu1 }
 0x1e9   :  { %v408_v12 = vadd.f32 %v407_v6, %v334_v0  ;;  %v991_v6 = vld [vmem:[#allocation7 + $0x58] sm:$0xff] }
 0x1eb   :  { %v417_v15 = vadd.f32 %v416_v13, %v408_v12 }
 0x1f0   :  { %v409_v14 = vpop.f32.mrf.mxu1 }
 0x1f1   :  { %v410_v16 = vadd.f32 %v409_v14, %v334_v0  ;;  %v988_v14 = vld [vmem:[#allocation7 + $0x40] sm:$0xff] }
 0x1f3   :  { %v418_v17 = vadd.f32 %v417_v15, %v410_v16 }
 0x1f5   :  { %v419_v18 = vrot.slane %v418_v17, 4 }
 0x1f7   :  { %v420_v19 = vadd.f32 %v419_v18, %v418_v17 }
 0x1f9   :  { %v421_v20 = vrot.slane %v420_v19, 2 }
 0x1fb   :  { %v422_v21 = vadd.f32 %v421_v20, %v420_v19 }
 0x1fd   :  { %v423_v22 = vrot.slane %v422_v21, 1 }
 0x1ff   :  { %v424_v23 = vadd.f32 %v423_v22, %v422_v21 }
 0x201   :  { %v425_v24 = vmul.f32 0.015625, %v424_v23 }
 0x203   :  { %v426_v25 = vsub.f32 %v393_v2, %v425_v24  ;;  %v427_v26 = vsub.f32 %v395_v1, %v425_v24  ;;  %v1306_v27 = vsub.f32 %v398_v3, %v425_v24  ;;  %v1308_v28 = vsub.f32 %v400_v5, %v425_v24  ;;  %v992_v3 = vld [vmem:[#allocation7 + $0x60] sm:$0xff] }
 0x204   :  { %v1310_v36 = vsub.f32 %v403_v8, %v425_v24  ;;  %v1314_v43 = vsub.f32 %v405_v10, %v425_v24  ;;  %v1318_v50 = vsub.f32 %v408_v12, %v425_v24  ;;  %v1322_v59 = vsub.f32 %v410_v16, %v425_v24  ;;  %577 = vmatpush.bf16.msra.mxu2 %v992_v3 }
 0x205   :  { %v434_v29 = vmul.f32 %v426_v25, %v426_v25  ;;  %v435_v30 = vmul.f32 %v427_v26, %v427_v26  ;;  %v436_v37 = vmul.f32 %v1306_v27, %v1306_v27  ;;  %v437_v44 = vmul.f32 %v1308_v28, %v1308_v28 }
 0x206   :  { %v438_v56 = vmul.f32 %v1310_v36, %v1310_v36  ;;  %v439_v60 = vmul.f32 %v1314_v43, %v1314_v43  ;;  %v440_v63 = vmul.f32 %v1318_v50, %v1318_v50  ;;  %v441_v1 = vmul.f32 %v1322_v59, %v1322_v59 }
 0x207   :  { %v442_v42 = vadd.f32 %v435_v30, %v434_v29  ;;  %v477_v29 = vperm.slane %v1303_v57, 2 }
 0x208   :  { %578 = vmatpush.bf16.msra.mxu2 %v991_v6 }
 0x209   :  { %v443_v49 = vadd.f32 %v442_v42, %v436_v37 }
 0x20b   :  { %v444_v58 = vadd.f32 %v443_v49, %v437_v44 }
 0x20c   :  { %579 = vmatpush.bf16.msra.mxu2 %v990_v9 }
 0x20d   :  { %v445_v61 = vadd.f32 %v444_v58, %v438_v56 }
 0x20f   :  { %v446_v0 = vadd.f32 %v445_v61, %v439_v60 }
 0x210   :  { %580 = vmatpush.bf16.msra.mxu2 %v989_v11 }
 0x211   :  { %v447_v2 = vadd.f32 %v446_v0, %v440_v63 }
 0x213   :  { %v448_v4 = vadd.f32 %v447_v2, %v441_v1 }
 0x214   :  { %581 = vmatpush.bf16.msra.mxu2 %v988_v14 }
 0x215   :  { %v449_v5 = vrot.slane %v448_v4, 4 }
 0x217   :  { %v450_v7 = vadd.f32 %v449_v5, %v448_v4 }
 0x219   :  { %v451_v8 = vrot.slane %v450_v7, 2 }
 0x21b   :  { %v452_v10 = vadd.f32 %v451_v8, %v450_v7  ;;  %v1381_v8 = vld [vmem:[%s1406_s6 + $0x4] sm:$0x7] }
 0x21d   :  { %v453_v12 = vrot.slane %v452_v10, 1 }
 0x21f   :  { %v454_v13 = vadd.f32 %v453_v12, %v452_v10 }
 0x221   :  { %v455_v15 = vmul.f32 0.015625, %v454_v13 }
 0x223   :  { %v456_v16 = vadd.f32 1e-05, %v455_v15 }
 0x225   :  { %1018 = vrsqrt.f32 %v456_v16  ;;  %vm463_vm4 = vweird.f32 %v456_v16 }
 0x22b   :  { %v1019_v17 = vpop.eup %1018 }
 0x22c   :  { %v458_v18 = vmul.f32 %v1019_v17, %v456_v16  ;;  %vm464_vm3 = vweird.f32 %v1019_v17 }
 0x22d   :  { %vm465_vm5 = vmor %vm463_vm4, %vm464_vm3 }
 0x22e   :  { %v459_v19 = vmul.f32 %v1019_v17, %v458_v18 }
 0x230   :  { %v460_v20 = vmul.f32 0.5, %v459_v19 }
 0x232   :  { %v461_v21 = vsub.f32 1.5, %v460_v20 }
 0x234   :  { %v462_v22 = vmul.f32 %v1019_v17, %v461_v21 }
 0x236   :  { %v466_v23 = vsel %vm465_vm5, %v1019_v17, %v462_v22 }
 0x237   :  { %v467_v24 = vmul.f32 %v466_v23, %v1303_v57 }
 0x239   :  { %v468_v30 = vperm.slane %v467_v24, 1 }
 0x23b   :  { %v469_v35 = vmul.f32 %v468_v30, %v426_v25  ;;  %v470_v37 = vmul.f32 %v468_v30, %v427_v26  ;;  %v471_v57 = vmul.f32 %v468_v30, %v1306_v27  ;;  %v472_v25 = vmul.f32 %v468_v30, %v1308_v28 }
 0x23c   :  { %v474_v27 = vmul.f32 %v468_v30, %v1314_v43 }
 0x23d   :  { %v478_v42 = vadd.f32 %v477_v29, %v469_v35  ;;  %v479_v44 = vadd.f32 %v477_v29, %v470_v37  ;;  %v480_v26 = vadd.f32 %v477_v29, %v471_v57  ;;  %v481_v61 = vadd.f32 %v477_v29, %v472_v25 }
 0x23e   :  { %v483_v0 = vadd.f32 %v477_v29, %v474_v27 }
 0x23f   :  { %v486_v49 = vmax.f32 %v478_v42, 0.0  ;;  %v487_v51 = vmax.f32 %v479_v44, 0.0  ;;  %v488_v62 = vmax.f32 %v480_v26, 0.0  ;;  %v489_v63 = vmax.f32 %v481_v61, 0.0  ;;  %v1003_v61 = vld [vmem:[#allocation8 + $0x38] sm:$0xff] }
 0x240   :  { %v491_v2 = vmax.f32 %v483_v0, 0.0  ;;  %765 = vmatpush.bf16.msra.mxu3 %v1003_v61  ;;  %v1002_v0 = vld [vmem:[#allocation8 + $0x30] sm:$0xff] }
 0x241   :  { %v1334_v56 = vadd.f32 %v486_v49, %v305_v33  ;;  %v1338_v58 = vadd.f32 %v487_v51, %v306_v34  ;;  %v1346_v31 = vadd.f32 %v488_v62, %v307_v40  ;;  %v1350_v32 = vadd.f32 %v489_v63, %v308_v41 }
 0x242   :  { %v473_v34 = vmul.f32 %v468_v30, %v1310_v36  ;;  %v1362_v39 = vadd.f32 %v491_v2, %v310_v48  ;;  %v476_v40 = vmul.f32 %v468_v30, %v1322_v59  ;;  %v475_v36 = vmul.f32 %v468_v30, %v1318_v50 }
 0x243   :  { %v521_v60 = vpack.c.bf16 %v1338_v58, %v1334_v56  ;;  %v522_v33 = vpack.c.bf16 %v1350_v32, %v1346_v31 }
 0x244   :  { %v482_v28 = vadd.f32 %v477_v29, %v473_v34  ;;  %v484_v43 = vadd.f32 %v477_v29, %v475_v36  ;;  %v485_v3 = vadd.f32 %v477_v29, %v476_v40  ;;  %766 = vmatpush.bf16.msra.mxu3 %v1002_v0 }
 0x245   :  { %582 = vmatmul.bf16.vlgmr.msra.gmra.mxu2 %v521_v60 }
 0x246   :  { %v490_v1 = vmax.f32 %v482_v28, 0.0  ;;  %v492_v4 = vmax.f32 %v484_v43, 0.0  ;;  %v493_v5 = vmax.f32 %v485_v3, 0.0  ;;  %v1001_v3 = vld [vmem:[#allocation8 + $0x28] sm:$0xff] }
 0x248   :  { %v1358_v38 = vadd.f32 %v490_v1, %v309_v47  ;;  %v1370_v45 = vadd.f32 %v492_v4, %v311_v54  ;;  %v1374_v46 = vadd.f32 %v493_v5, %v312_v55  ;;  %v525_v54 = vperm.slane %v1381_v8, 0  ;;  %767 = vmatpush.bf16.msra.mxu3 %v1001_v3 }
 0x24a   :  { %v523_v41 = vpack.c.bf16 %v1362_v39, %v1358_v38  ;;  %v524_v47 = vpack.c.bf16 %v1374_v46, %v1370_v45 }
 0x255   :  { %587 = vmatmul.bf16.gmra.mxu2 %v522_v33 }
 0x265   :  { %592 = vmatmul.bf16.gmra.mxu2 %v523_v41 }
 0x275   :  { %597 = vmatmul.bf16.gmra.mxu2 %v524_v47 }
 0x2c8   :  { %v583_v48 = vpop.f32.mrf.mxu2 }
 0x2c9   :  { %v584_v55 = vadd.f32 %v583_v48, %v525_v54 }
 0x2d0   :  { %v585_v59 = vpop.f32.mrf.mxu2 }
 0x2d1   :  { %v586_v53 = vadd.f32 %v585_v59, %v525_v54  ;;  %v1000_v59 = vld [vmem:[#allocation8 + $0x20] sm:$0xff] }
 0x2d2   :  { %768 = vmatpush.bf16.msra.mxu3 %v1000_v59 }
 0x2d3   :  { %v603_v10 = vadd.f32 %v586_v53, %v584_v55 }
 0x2d8   :  { %v588_v50 = vpop.f32.mrf.mxu2 }
 0x2d9   :  { %v589_v9 = vadd.f32 %v588_v50, %v525_v54 }
 0x2db   :  { %v604_v13 = vadd.f32 %v603_v10, %v589_v9 }
 0x2e0   :  { %v590_v6 = vpop.f32.mrf.mxu2 }
 0x2e1   :  { %v591_v11 = vadd.f32 %v590_v6, %v525_v54 }
 0x2e3   :  { %v605_v15 = vadd.f32 %v604_v13, %v591_v11 }
 0x2e8   :  { %v593_v7 = vpop.f32.mrf.mxu2 }
 0x2e9   :  { %v594_v14 = vadd.f32 %v593_v7, %v525_v54  ;;  %v999_v7 = vld [vmem:[#allocation8 + $0x18] sm:$0xff] }
 0x2ea   :  { %769 = vmatpush.bf16.msra.mxu3 %v999_v7 }
 0x2eb   :  { %v606_v17 = vadd.f32 %v605_v15, %v594_v14 }
 0x2f0   :  { %v595_v52 = vpop.f32.mrf.mxu2 }
 0x2f1   :  { %v596_v16 = vadd.f32 %v595_v52, %v525_v54 }
 0x2f3   :  { %v607_v19 = vadd.f32 %v606_v17, %v596_v16 }
 0x2f8   :  { %v598_v12 = vpop.f32.mrf.mxu2 }
 0x2f9   :  { %v599_v18 = vadd.f32 %v598_v12, %v525_v54  ;;  %v996_v12 = vld [vmem:[#allocation8] sm:$0xff] }
 0x2fb   :  { %v608_v21 = vadd.f32 %v607_v19, %v599_v18 }
 0x300   :  { %v600_v20 = vpop.f32.mrf.mxu2 }
 0x301   :  { %v601_v22 = vadd.f32 %v600_v20, %v525_v54 }
 0x303   :  { %v609_v23 = vadd.f32 %v608_v21, %v601_v22 }
 0x305   :  { %v610_v24 = vrot.slane %v609_v23, 4 }
 0x307   :  { %v611_v29 = vadd.f32 %v610_v24, %v609_v23  ;;  %v668_v23 = vperm.slane %v1381_v8, 2 }
 0x309   :  { %v612_v30 = vrot.slane %v611_v29, 2 }
 0x30b   :  { %v613_v35 = vadd.f32 %v612_v30, %v611_v29 }
 0x30d   :  { %v614_v37 = vrot.slane %v613_v35, 1 }
 0x30f   :  { %v615_v42 = vadd.f32 %v614_v37, %v613_v35 }
 0x311   :  { %v616_v44 = vmul.f32 0.015625, %v615_v42 }
 0x313   :  { %v617_v49 = vsub.f32 %v584_v55, %v616_v44  ;;  %v618_v51 = vsub.f32 %v586_v53, %v616_v44  ;;  %v619_v60 = vsub.f32 %v589_v9, %v616_v44  ;;  %v620_v57 = vsub.f32 %v591_v11, %v616_v44  ;;  %v998_v53 = vld [vmem:[#allocation8 + $0x10] sm:$0xff]  ;;  %v997_v9 = vld [vmem:[#allocation8 + $0x8] sm:$0xff] }
 0x314   :  { %v621_v62 = vsub.f32 %v594_v14, %v616_v44  ;;  %v622_v34 = vsub.f32 %v596_v16, %v616_v44  ;;  %v623_v1 = vsub.f32 %v599_v18, %v616_v44  ;;  %v624_v41 = vsub.f32 %v601_v22, %v616_v44  ;;  %770 = vmatpush.bf16.msra.mxu3 %v998_v53 }
 0x315   :  { %v625_v25 = vmul.f32 %v617_v49, %v617_v49  ;;  %v626_v26 = vmul.f32 %v618_v51, %v618_v51  ;;  %v627_v63 = vmul.f32 %v619_v60, %v619_v60  ;;  %v628_v27 = vmul.f32 %v620_v57, %v620_v57 }
 0x316   :  { %v629_v2 = vmul.f32 %v621_v62, %v621_v62  ;;  %v630_v36 = vmul.f32 %v622_v34, %v622_v34  ;;  %v631_v4 = vmul.f32 %v623_v1, %v623_v1  ;;  %v632_v47 = vmul.f32 %v624_v41, %v624_v41 }
 0x317   :  { %v633_v33 = vadd.f32 %v626_v26, %v625_v25 }
 0x318   :  { %771 = vmatpush.bf16.msra.mxu3 %v997_v9 }
 0x319   :  { %v634_v28 = vadd.f32 %v633_v33, %v627_v63 }
 0x31b   :  { %v635_v40 = vadd.f32 %v634_v28, %v628_v27 }
 0x31c   :  { %772 = vmatpush.bf16.msra.mxu3 %v996_v12 }
 0x31d   :  { %v636_v43 = vadd.f32 %v635_v40, %v629_v2 }
 0x31f   :  { %v637_v5 = vadd.f32 %v636_v43, %v630_v36 }
 0x321   :  { %v638_v48 = vadd.f32 %v637_v5, %v631_v4 }
 0x323   :  { %v639_v50 = vadd.f32 %v638_v48, %v632_v47 }
 0x325   :  { %v640_v6 = vrot.slane %v639_v50, 4 }
 0x327   :  { %v641_v52 = vadd.f32 %v640_v6, %v639_v50 }
 0x329   :  { %v642_v54 = vrot.slane %v641_v52, 2 }
 0x32b   :  { %v643_v55 = vadd.f32 %v642_v54, %v641_v52 }
 0x32d   :  { %v644_v10 = vrot.slane %v643_v55, 1 }
 0x32f   :  { %v645_v11 = vadd.f32 %v644_v10, %v643_v55 }
 0x331   :  { %v646_v13 = vmul.f32 0.015625, %v645_v11 }
 0x333   :  { %v647_v14 = vadd.f32 1e-05, %v646_v13 }
 0x335   :  { %1020 = vrsqrt.f32 %v647_v14  ;;  %vm654_vm7 = vweird.f32 %v647_v14 }
 0x33b   :  { %v1021_v15 = vpop.eup %1020 }
 0x33c   :  { %v649_v16 = vmul.f32 %v1021_v15, %v647_v14  ;;  %vm655_vm6 = vweird.f32 %v1021_v15 }
 0x33d   :  { %vm656_vm8 = vmor %vm654_vm7, %vm655_vm6 }
 0x33e   :  { %v650_v17 = vmul.f32 %v1021_v15, %v649_v16 }
 0x340   :  { %v651_v18 = vmul.f32 0.5, %v650_v17 }
 0x342   :  { %v652_v19 = vsub.f32 1.5, %v651_v18 }
 0x344   :  { %v653_v20 = vmul.f32 %v1021_v15, %v652_v19 }
 0x346   :  { %v657_v21 = vsel %vm656_vm8, %v1021_v15, %v653_v20 }
 0x347   :  { %v658_v22 = vmul.f32 %v1381_v8, %v657_v21 }
 0x349   :  { %v659_v24 = vperm.slane %v658_v22, 1 }
 0x34b   :  { %v667_v29 = vmul.f32 %v659_v24, %v624_v41  ;;  %v660_v30 = vmul.f32 %v659_v24, %v617_v49  ;;  %v661_v35 = vmul.f32 %v659_v24, %v618_v51  ;;  %v662_v37 = vmul.f32 %v659_v24, %v619_v60 }
 0x34c   :  { %v663_v42 = vmul.f32 %v659_v24, %v620_v57  ;;  %v664_v44 = vmul.f32 %v659_v24, %v621_v62  ;;  %v665_v25 = vmul.f32 %v659_v24, %v622_v34  ;;  %v666_v26 = vmul.f32 %v659_v24, %v623_v1 }
 0x34d   :  { %v669_v61 = vadd.f32 %v668_v23, %v660_v30  ;;  %v670_v63 = vadd.f32 %v668_v23, %v661_v35  ;;  %v671_v33 = vadd.f32 %v668_v23, %v662_v37  ;;  %v676_v27 = vadd.f32 %v668_v23, %v667_v29 }
 0x34e   :  { %v672_v28 = vadd.f32 %v668_v23, %v663_v42  ;;  %v673_v0 = vadd.f32 %v668_v23, %v664_v44  ;;  %v674_v2 = vadd.f32 %v668_v23, %v665_v25  ;;  %v675_v40 = vadd.f32 %v668_v23, %v666_v26 }
 0x34f   :  { %v677_v36 = vmax.f32 %v669_v61, 0.0  ;;  %v678_v43 = vmax.f32 %v670_v63, 0.0  ;;  %v679_v8 = vmax.f32 %v671_v33, 0.0  ;;  %v684_v3 = vmax.f32 %v676_v27, 0.0 }
 0x350   :  { %v680_v41 = vmax.f32 %v672_v28, 0.0  ;;  %v681_v49 = vmax.f32 %v673_v0, 0.0  ;;  %v682_v51 = vmax.f32 %v674_v2, 0.0  ;;  %v683_v60 = vmax.f32 %v675_v40, 0.0 }
 0x351   :  { %v685_v57 = vadd.f32 %v677_v36, %v1334_v56  ;;  %v686_v62 = vadd.f32 %v678_v43, %v1338_v58  ;;  %v687_v34 = vadd.f32 %v679_v8, %v1346_v31  ;;  %v692_v1 = vadd.f32 %v684_v3, %v1374_v46  ;;  %v1015_v56 = vld [vmem:[%s1408_s8] ss:$0 sm:$0xff]  ;;  %s1156_s8 = smov [#allocation10]  }
 0x352   :  { %v688_v4 = vadd.f32 %v680_v41, %v1350_v32  ;;  %v689_v5 = vadd.f32 %v681_v49, %v1358_v38  ;;  %v690_v47 = vadd.f32 %v682_v51, %v1362_v39  ;;  %v691_v48 = vadd.f32 %v683_v60, %v1370_v45  ;;  %s806_s14 = sshll.u32 %s1156_s8, 4  ;;  %s807_s14 = int_to_ptr.vmem [resolvable:$true] %s806_s14 }
 0x353   :  { %v693_v59 = vpack.c.bf16 %v686_v62, %v685_v57 }
 0x354   :  { %v694_v50 = vpack.c.bf16 %v688_v4, %v687_v34  ;;  %v695_v6 = vpack.c.bf16 %v690_v47, %v689_v5  ;;  %v696_v7 = vpack.c.bf16 %v692_v1, %v691_v48 }
 0x355   :  { %773 = vmatmul.bf16.vlgmr.msra.gmra.mxu3 %v693_v59 }
 0x365   :  { %778 = vmatmul.bf16.gmra.mxu3 %v694_v50 }
 0x375   :  { %783 = vmatmul.bf16.gmra.mxu3 %v695_v6 }
 0x385   :  { %788 = vmatmul.bf16.gmra.mxu3 %v696_v7 }
 0x3d8   :  { %v774_v58 = vpop.f32.mrf.mxu3 }
 0x3d9   :  { %v775_v31 = vadd.f32 %v1015_v56, %v774_v58 }
 0x3db   :  { %794 = vst [vmem:[#allocation10] sm:$0xff] %v775_v31 }
 0x3e0   :  { %v776_v32 = vpop.f32.mrf.mxu3 }
 0x3e1   :  { %v777_v38 = vadd.f32 %v1015_v56, %v776_v32 }
 0x3e3   :  { %795 = vst [vmem:[#allocation10 + $0x8] sm:$0xff] %v777_v38 }
 0x3e8   :  { %v779_v39 = vpop.f32.mrf.mxu3 }
 0x3e9   :  { %v780_v45 = vadd.f32 %v1015_v56, %v779_v39 }
 0x3eb   :  { %796 = vst [vmem:[#allocation10 + $0x10] sm:$0xff] %v780_v45 }
 0x3f0   :  { %v781_v46 = vpop.f32.mrf.mxu3 }
 0x3f1   :  { %v782_v52 = vadd.f32 %v1015_v56, %v781_v46 }
 0x3f3   :  { %797 = vst [vmem:[#allocation10 + $0x18] sm:$0xff] %v782_v52 }
 0x3f8   :  { %v784_v54 = vpop.f32.mrf.mxu3 }
 0x3f9   :  { %v785_v53 = vadd.f32 %v1015_v56, %v784_v54 }
 0x3fb   :  { %798 = vst [vmem:[#allocation10 + $0x20] sm:$0xff] %v785_v53 }
 0x400   :  { %v786_v55 = vpop.f32.mrf.mxu3 }
 0x401   :  { %v787_v9 = vadd.f32 %v1015_v56, %v786_v55 }
 0x403   :  { %799 = vst [vmem:[#allocation10 + $0x28] sm:$0xff] %v787_v9 }
 0x408   :  { %v789_v10 = vpop.f32.mrf.mxu3 }
 0x409   :  { %v790_v11 = vadd.f32 %v1015_v56, %v789_v10 }
 0x40b   :  { %800 = vst [vmem:[#allocation10 + $0x30] sm:$0xff] %v790_v11 }
 0x410   :  { %v791_v12 = vpop.f32.mrf.mxu3 }
 0x411   :  { %v792_v13 = vadd.f32 %v1015_v56, %v791_v12 }
 0x413   :  { %801 = vst [vmem:[#allocation10 + $0x38] sm:$0xff] %v792_v13 }
 0x414   :  { %814 = dma.vmem_to_hbm [thread:$0]  %s807_s14, 1024, %s809_s17, [#allocation4], %s1157_s18, %s1157_s18, %s1158_s19  }
 0x415   :  { %1148 = dma.done.wait [#allocation4], 1024  }
 0x416   :  { %1149 = vsyncadd [#allocation4], 4294966272 }
 0x417   :  { %819 = vsyncpa [#allocation3], 1 }
 0x418   :  { %820 = vsyncpa [#allocation6], 1 }
 0x419   :  { %821 = vsyncpa [#allocation9], 1 }
 0x41a   :  { %822 = vsyncpa [#allocation4], 1 }

</bundles_post_ra>
